<compile_context>
chip_gen: v7x
topology: tpu7x:2x2x1
jax: 0.10.0
libtpu: 0.0.40
codegen_flags: <defaults>
</compile_context>

<pallas_src>
import functools

import jax
import jax.numpy as jnp
from jax.experimental import pallas as pl
from jax.experimental.pallas import tpu as pltpu


# ---------------------------------------------------------------------------
# Static (trace-time) planning helpers
# ---------------------------------------------------------------------------
def _level_geometry(H, W, levels):
    """Per level: (kh, kw, oh, ow) with PyTorch MaxPool2d floor semantics."""
    geoms = []
    for level in levels:
        kh, kw = H // level, W // level
        if kh == 0 or kw == 0:
            raise ValueError(
                f"SPP level {level} exceeds spatial dims ({H}x{W}); "
                "nn.MaxPool2d kernel size would be 0.")
        geoms.append((kh, kw, H // kh, W // kw))  # oh = H//kh == floor((H-kh)/kh)+1
    return tuple(geoms)


def _build_plan(geoms):
    """Hierarchical plan: for each level, either pool from the input block
    (src=None) or derive from an already-pooled finer level (src=(idx, rh, rw))
    when the finer windows tile the coarser ones exactly."""
    order = tuple(sorted(range(len(geoms)),
                         key=lambda i: geoms[i][2] * geoms[i][3], reverse=True))
    plan, done = {}, []
    for idx in order:
        kh, kw, oh, ow = geoms[idx]
        best = None
        for s in done:
            skh, skw, soh, sow = geoms[s]
            if kh % skh or kw % skw:
                continue
            rh, rw = kh // skh, kw // skw
            if oh * rh > soh or ow * rw > sow:
                continue
            if best is None or rh * rw < best[1] * best[2]:
                best = (s, rh, rw)
        plan[idx] = best
        done.append(idx)
    return order, tuple(plan[i] for i in range(len(geoms)))


def _choose_c_block(C, H, W, itemsize):
    """Tile C only if it can stay a multiple of 128 lanes; conservative budget
    keeps double-buffered input blocks inside v5e's 16 MiB scoped VMEM."""
    # TODO(synk): make the VMEM budget generation-aware (v7x has 64 MiB physical).
    if C % 128 != 0:
        return C
    budget = 6 * 1024 * 1024
    per_c = 2 * H * W * itemsize            # double-buffered input bytes / channel
    cb = max(128, (budget // per_c) // 128 * 128)
    cb = min(cb, C)
    while C % cb:
        cb -= 128
    return cb


# ---------------------------------------------------------------------------
# Kernel
# ---------------------------------------------------------------------------
def _spp_kernel(x_ref, o_ref, *, geoms, order, plan):
    """x_ref: (1, H, W, Cb) channels-last block (C on lanes).
       o_ref: (1, S_total, Cb) — all levels packed as (level, i, j) rows."""

    def pool_from_input(kh, kw, oh, ow):
        win = []
        for i in range(oh):
            # H-direction pooling: VPU maximum tree over streamed row loads.
            r = x_ref[0, i * kh, :, :]
            for d in range(1, kh):
                r = jnp.maximum(r, x_ref[0, i * kh + d, :, :])
            # W-direction pooling: small sublane reduce per window, lanes stay dense.
            win.append([jnp.max(r[j * kw:(j + 1) * kw, :], axis=0, keepdims=True)
                        for j in range(ow)])
        return win

    def pool_from_grid(src, rh, rw, oh, ow):
        win = []
        for i in range(oh):
            row = []
            for j in range(ow):
                m = src[i * rh][j * rw]
                for di in range(rh):
                    for dj in range(rw):
                        if di or dj:
                            m = jnp.maximum(m, src[i * rh + di][j * rw + dj])
                row.append(m)
            win.append(row)
        return win

    grids = {}
    for idx in order:
        kh, kw, oh, ow = geoms[idx]
        src = plan[idx]
        if src is None:
            grids[idx] = pool_from_input(kh, kw, oh, ow)
        else:
            grids[idx] = pool_from_grid(grids[src[0]], src[1], src[2], oh, ow)

    # Single lane-dense store covering every pyramid level.
    pieces = []
    for idx in range(len(geoms)):
        _, _, oh, ow = geoms[idx]
        for i in range(oh):
            for j in range(ow):
                pieces.append(grids[idx][i][j])           # each (1, Cb)
    o_ref[0, :, :] = jnp.concatenate(pieces, axis=0).astype(o_ref.dtype)


# ---------------------------------------------------------------------------
# Wrappers
# ---------------------------------------------------------------------------
def spatial_pyramid_pooling_nhwc(x_nhwc, levels):
    """One pallas_call computing every pyramid level.
    Returns (N, S_total, C) with the middle axis ordered (level, i, j)."""
    N, H, W, C = x_nhwc.shape
    geoms = _level_geometry(H, W, levels)
    order, plan = _build_plan(geoms)
    s_total = sum(oh * ow for _, _, oh, ow in geoms)
    cb = _choose_c_block(C, H, W, x_nhwc.dtype.itemsize)

    kernel = functools.partial(_spp_kernel, geoms=geoms, order=order, plan=plan)
    n_from_x = max(1, sum(1 for p in plan if p is None))
    itemsize = x_nhwc.dtype.itemsize
    cost = pl.CostEstimate(
        flops=N * C * H * W * n_from_x,
        transcendentals=0,
        bytes_accessed=N * C * H * W * itemsize + N * s_total * C * itemsize)

    return pl.pallas_call(
        kernel,
        out_shape=jax.ShapeDtypeStruct((N, s_total, C), x_nhwc.dtype),
        grid=(N, C // cb),
        in_specs=[pl.BlockSpec((1, H, W, cb), lambda n, c: (n, 0, 0, c))],
        out_specs=pl.BlockSpec((1, s_total, cb), lambda n, c: (n, 0, c)),
        compiler_params=pltpu.CompilerParams(
            dimension_semantics=("parallel", "parallel")),
        cost_estimate=cost,
    )(x_nhwc)


def spatial_pyramid_pooling(x, levels):
    """NCHW entry point matching the PyTorch module:
    per level MaxPool2d(kernel=stride=(H//L, W//L)) -> flatten(1) -> concat."""
    N, C, H, W = x.shape
    geoms = _level_geometry(H, W, levels)
    # Channels-last for the kernel so C rides the 128-lane axis.
    x_nhwc = jnp.transpose(x, (0, 2, 3, 1))
    y = spatial_pyramid_pooling_nhwc(x_nhwc, levels)      # (N, S_total, C)
    # Re-order only the tiny pooled tensor into PyTorch's (level, c, i, j) order.
    pieces, off = [], 0
    for _, _, oh, ow in geoms:
        s = oh * ow
        blk = y[:, off:off + s, :]                        # (N, oh*ow, C)
        pieces.append(jnp.transpose(blk, (0, 2, 1)).reshape(N, C * s))
        off += s
    return jnp.concatenate(pieces, axis=1)


def _reference_spp(x, levels):
    """Pure-JAX reference reproducing nn.MaxPool2d((kh,kw),(kh,kw)) + flatten + cat."""
    N, C, H, W = x.shape
    outs = []
    for level in levels:
        kh, kw = H // level, W // level
        oh, ow = H // kh, W // kw
        xv = x[:, :, : oh * kh, : ow * kw].reshape(N, C, oh, kh, ow, kw)
        outs.append(jnp.max(xv, axis=(3, 5)).reshape(N, -1))
    return jnp.concatenate(outs, axis=1)


if __name__ == "__main__":
    key = jax.random.PRNGKey(0)

    # Primary config (matches the module spec's small shapes).
    levels = (1, 2, 4)
    x = jax.random.normal(key, (2, 4, 16, 16), dtype=jnp.float32)
    out = jax.block_until_ready(spatial_pyramid_pooling(x, levels))
    ref = _reference_spp(x, levels)
    assert out.shape == (2, 4 * (1 + 4 + 16)), out.shape
    assert jnp.allclose(out, ref), "Pallas SPP mismatch vs reference (levels 1,2,4)"

    # Secondary config: non-divisible level exercises floor semantics and the
    # non-hierarchical (pool-from-input) fallback path.
    levels2 = (1, 2, 3)
    x2 = jax.random.normal(jax.random.PRNGKey(0), (1, 8, 20, 20), dtype=jnp.float32)
    out2 = jax.block_until_ready(spatial_pyramid_pooling(x2, levels2))
    ref2 = _reference_spp(x2, levels2)
    assert out2.shape == ref2.shape, (out2.shape, ref2.shape)
    assert jnp.allclose(out2, ref2), "Pallas SPP mismatch vs reference (levels 1,2,3)"

    print("KERNEL_OK")
</pallas_src>

<mosaic_0001>
module attributes {stable_mosaic.version = 11 : i64} {
  func.func @_spp_kernel(%arg0: i32, %arg1: i32, %arg2: memref<1x16x16x4xf32, #tpu.memory_space<vmem>>, %arg3: memref<1x21x4xf32, #tpu.memory_space<vmem>>) attributes {dimension_semantics = [#tpu.dimension_semantics<parallel>, #tpu.dimension_semantics<parallel>], iteration_bounds = array<i64: 2, 1>, scalar_prefetch = 0 : i64, scratch_operands = 0 : i64, tpu.core_type = #tpu.core_type<tc>, window_params = [{transform_indices = @transform_0, window_bounds = array<i64: 1, 16, 16, 4>}, {transform_indices = @transform_1, window_bounds = array<i64: 1, 21, 4>}]} {
    %c0 = arith.constant 0 : index
    %c0_0 = arith.constant 0 : index
    %c0_1 = arith.constant 0 : index
    %c0_2 = arith.constant 0 : index
    %0 = vector.load %arg2[%c0, %c0_0, %c0_1, %c0_2] : memref<1x16x16x4xf32, #tpu.memory_space<vmem>>, vector<1x1x16x4xf32>
    %1 = vector.shape_cast %0 : vector<1x1x16x4xf32> to vector<16x4xf32>
    %c0_3 = arith.constant 0 : index
    %c1 = arith.constant 1 : index
    %c0_4 = arith.constant 0 : index
    %c0_5 = arith.constant 0 : index
    %2 = vector.load %arg2[%c0_3, %c1, %c0_4, %c0_5] : memref<1x16x16x4xf32, #tpu.memory_space<vmem>>, vector<1x1x16x4xf32>
    %3 = vector.shape_cast %2 : vector<1x1x16x4xf32> to vector<16x4xf32>
    %4 = arith.maximumf %1, %3 : vector<16x4xf32>
    %c0_6 = arith.constant 0 : index
    %c2 = arith.constant 2 : index
    %c0_7 = arith.constant 0 : index
    %c0_8 = arith.constant 0 : index
    %5 = vector.load %arg2[%c0_6, %c2, %c0_7, %c0_8] : memref<1x16x16x4xf32, #tpu.memory_space<vmem>>, vector<1x1x16x4xf32>
    %6 = vector.shape_cast %5 : vector<1x1x16x4xf32> to vector<16x4xf32>
    %7 = arith.maximumf %4, %6 : vector<16x4xf32>
    %c0_9 = arith.constant 0 : index
    %c3 = arith.constant 3 : index
    %c0_10 = arith.constant 0 : index
    %c0_11 = arith.constant 0 : index
    %8 = vector.load %arg2[%c0_9, %c3, %c0_10, %c0_11] : memref<1x16x16x4xf32, #tpu.memory_space<vmem>>, vector<1x1x16x4xf32>
    %9 = vector.shape_cast %8 : vector<1x1x16x4xf32> to vector<16x4xf32>
    %10 = arith.maximumf %7, %9 : vector<16x4xf32>
    %11 = vector.extract_strided_slice %10 {offsets = [0, 0], sizes = [4, 4], strides = [1, 1]} : vector<16x4xf32> to vector<4x4xf32>
    %cst = arith.constant dense<0xFF800000> : vector<4xf32>
    %12 = vector.multi_reduction <maximumf>, %11, %cst [0] : vector<4x4xf32> to vector<4xf32>
    %13 = vector.shape_cast %12 : vector<4xf32> to vector<1x4xf32>
    %14 = vector.extract_strided_slice %10 {offsets = [4, 0], sizes = [4, 4], strides = [1, 1]} : vector<16x4xf32> to vector<4x4xf32>
    %cst_12 = arith.constant dense<0xFF800000> : vector<4xf32>
    %15 = vector.multi_reduction <maximumf>, %14, %cst_12 [0] : vector<4x4xf32> to vector<4xf32>
    %16 = vector.shape_cast %15 : vector<4xf32> to vector<1x4xf32>
    %17 = vector.extract_strided_slice %10 {offsets = [8, 0], sizes = [4, 4], strides = [1, 1]} : vector<16x4xf32> to vector<4x4xf32>
    %cst_13 = arith.constant dense<0xFF800000> : vector<4xf32>
    %18 = vector.multi_reduction <maximumf>, %17, %cst_13 [0] : vector<4x4xf32> to vector<4xf32>
    %19 = vector.shape_cast %18 : vector<4xf32> to vector<1x4xf32>
    %20 = vector.extract_strided_slice %10 {offsets = [12, 0], sizes = [4, 4], strides = [1, 1]} : vector<16x4xf32> to vector<4x4xf32>
    %cst_14 = arith.constant dense<0xFF800000> : vector<4xf32>
    %21 = vector.multi_reduction <maximumf>, %20, %cst_14 [0] : vector<4x4xf32> to vector<4xf32>
    %22 = vector.shape_cast %21 : vector<4xf32> to vector<1x4xf32>
    %c0_15 = arith.constant 0 : index
    %c4 = arith.constant 4 : index
    %c0_16 = arith.constant 0 : index
    %c0_17 = arith.constant 0 : index
    %23 = vector.load %arg2[%c0_15, %c4, %c0_16, %c0_17] : memref<1x16x16x4xf32, #tpu.memory_space<vmem>>, vector<1x1x16x4xf32>
    %24 = vector.shape_cast %23 : vector<1x1x16x4xf32> to vector<16x4xf32>
    %c0_18 = arith.constant 0 : index
    %c5 = arith.constant 5 : index
    %c0_19 = arith.constant 0 : index
    %c0_20 = arith.constant 0 : index
    %25 = vector.load %arg2[%c0_18, %c5, %c0_19, %c0_20] : memref<1x16x16x4xf32, #tpu.memory_space<vmem>>, vector<1x1x16x4xf32>
    %26 = vector.shape_cast %25 : vector<1x1x16x4xf32> to vector<16x4xf32>
    %27 = arith.maximumf %24, %26 : vector<16x4xf32>
    %c0_21 = arith.constant 0 : index
    %c6 = arith.constant 6 : index
    %c0_22 = arith.constant 0 : index
    %c0_23 = arith.constant 0 : index
    %28 = vector.load %arg2[%c0_21, %c6, %c0_22, %c0_23] : memref<1x16x16x4xf32, #tpu.memory_space<vmem>>, vector<1x1x16x4xf32>
    %29 = vector.shape_cast %28 : vector<1x1x16x4xf32> to vector<16x4xf32>
    %30 = arith.maximumf %27, %29 : vector<16x4xf32>
    %c0_24 = arith.constant 0 : index
    %c7 = arith.constant 7 : index
    %c0_25 = arith.constant 0 : index
    %c0_26 = arith.constant 0 : index
    %31 = vector.load %arg2[%c0_24, %c7, %c0_25, %c0_26] : memref<1x16x16x4xf32, #tpu.memory_space<vmem>>, vector<1x1x16x4xf32>
    %32 = vector.shape_cast %31 : vector<1x1x16x4xf32> to vector<16x4xf32>
    %33 = arith.maximumf %30, %32 : vector<16x4xf32>
    %34 = vector.extract_strided_slice %33 {offsets = [0, 0], sizes = [4, 4], strides = [1, 1]} : vector<16x4xf32> to vector<4x4xf32>
    %cst_27 = arith.constant dense<0xFF800000> : vector<4xf32>
    %35 = vector.multi_reduction <maximumf>, %34, %cst_27 [0] : vector<4x4xf32> to vector<4xf32>
    %36 = vector.shape_cast %35 : vector<4xf32> to vector<1x4xf32>
    %37 = vector.extract_strided_slice %33 {offsets = [4, 0], sizes = [4, 4], strides = [1, 1]} : vector<16x4xf32> to vector<4x4xf32>
    %cst_28 = arith.constant dense<0xFF800000> : vector<4xf32>
    %38 = vector.multi_reduction <maximumf>, %37, %cst_28 [0] : vector<4x4xf32> to vector<4xf32>
    %39 = vector.shape_cast %38 : vector<4xf32> to vector<1x4xf32>
    %40 = vector.extract_strided_slice %33 {offsets = [8, 0], sizes = [4, 4], strides = [1, 1]} : vector<16x4xf32> to vector<4x4xf32>
    %cst_29 = arith.constant dense<0xFF800000> : vector<4xf32>
    %41 = vector.multi_reduction <maximumf>, %40, %cst_29 [0] : vector<4x4xf32> to vector<4xf32>
    %42 = vector.shape_cast %41 : vector<4xf32> to vector<1x4xf32>
    %43 = vector.extract_strided_slice %33 {offsets = [12, 0], sizes = [4, 4], strides = [1, 1]} : vector<16x4xf32> to vector<4x4xf32>
    %cst_30 = arith.constant dense<0xFF800000> : vector<4xf32>
    %44 = vector.multi_reduction <maximumf>, %43, %cst_30 [0] : vector<4x4xf32> to vector<4xf32>
    %45 = vector.shape_cast %44 : vector<4xf32> to vector<1x4xf32>
    %c0_31 = arith.constant 0 : index
    %c8 = arith.constant 8 : index
    %c0_32 = arith.constant 0 : index
    %c0_33 = arith.constant 0 : index
    %46 = vector.load %arg2[%c0_31, %c8, %c0_32, %c0_33] : memref<1x16x16x4xf32, #tpu.memory_space<vmem>>, vector<1x1x16x4xf32>
    %47 = vector.shape_cast %46 : vector<1x1x16x4xf32> to vector<16x4xf32>
    %c0_34 = arith.constant 0 : index
    %c9 = arith.constant 9 : index
    %c0_35 = arith.constant 0 : index
    %c0_36 = arith.constant 0 : index
    %48 = vector.load %arg2[%c0_34, %c9, %c0_35, %c0_36] : memref<1x16x16x4xf32, #tpu.memory_space<vmem>>, vector<1x1x16x4xf32>
    %49 = vector.shape_cast %48 : vector<1x1x16x4xf32> to vector<16x4xf32>
    %50 = arith.maximumf %47, %49 : vector<16x4xf32>
    %c0_37 = arith.constant 0 : index
    %c10 = arith.constant 10 : index
    %c0_38 = arith.constant 0 : index
    %c0_39 = arith.constant 0 : index
    %51 = vector.load %arg2[%c0_37, %c10, %c0_38, %c0_39] : memref<1x16x16x4xf32, #tpu.memory_space<vmem>>, vector<1x1x16x4xf32>
    %52 = vector.shape_cast %51 : vector<1x1x16x4xf32> to vector<16x4xf32>
    %53 = arith.maximumf %50, %52 : vector<16x4xf32>
    %c0_40 = arith.constant 0 : index
    %c11 = arith.constant 11 : index
    %c0_41 = arith.constant 0 : index
    %c0_42 = arith.constant 0 : index
    %54 = vector.load %arg2[%c0_40, %c11, %c0_41, %c0_42] : memref<1x16x16x4xf32, #tpu.memory_space<vmem>>, vector<1x1x16x4xf32>
    %55 = vector.shape_cast %54 : vector<1x1x16x4xf32> to vector<16x4xf32>
    %56 = arith.maximumf %53, %55 : vector<16x4xf32>
    %57 = vector.extract_strided_slice %56 {offsets = [0, 0], sizes = [4, 4], strides = [1, 1]} : vector<16x4xf32> to vector<4x4xf32>
    %cst_43 = arith.constant dense<0xFF800000> : vector<4xf32>
    %58 = vector.multi_reduction <maximumf>, %57, %cst_43 [0] : vector<4x4xf32> to vector<4xf32>
    %59 = vector.shape_cast %58 : vector<4xf32> to vector<1x4xf32>
    %60 = vector.extract_strided_slice %56 {offsets = [4, 0], sizes = [4, 4], strides = [1, 1]} : vector<16x4xf32> to vector<4x4xf32>
    %cst_44 = arith.constant dense<0xFF800000> : vector<4xf32>
    %61 = vector.multi_reduction <maximumf>, %60, %cst_44 [0] : vector<4x4xf32> to vector<4xf32>
    %62 = vector.shape_cast %61 : vector<4xf32> to vector<1x4xf32>
    %63 = vector.extract_strided_slice %56 {offsets = [8, 0], sizes = [4, 4], strides = [1, 1]} : vector<16x4xf32> to vector<4x4xf32>
    %cst_45 = arith.constant dense<0xFF800000> : vector<4xf32>
    %64 = vector.multi_reduction <maximumf>, %63, %cst_45 [0] : vector<4x4xf32> to vector<4xf32>
    %65 = vector.shape_cast %64 : vector<4xf32> to vector<1x4xf32>
    %66 = vector.extract_strided_slice %56 {offsets = [12, 0], sizes = [4, 4], strides = [1, 1]} : vector<16x4xf32> to vector<4x4xf32>
    %cst_46 = arith.constant dense<0xFF800000> : vector<4xf32>
    %67 = vector.multi_reduction <maximumf>, %66, %cst_46 [0] : vector<4x4xf32> to vector<4xf32>
    %68 = vector.shape_cast %67 : vector<4xf32> to vector<1x4xf32>
    %c0_47 = arith.constant 0 : index
    %c12 = arith.constant 12 : index
    %c0_48 = arith.constant 0 : index
    %c0_49 = arith.constant 0 : index
    %69 = vector.load %arg2[%c0_47, %c12, %c0_48, %c0_49] : memref<1x16x16x4xf32, #tpu.memory_space<vmem>>, vector<1x1x16x4xf32>
    %70 = vector.shape_cast %69 : vector<1x1x16x4xf32> to vector<16x4xf32>
    %c0_50 = arith.constant 0 : index
    %c13 = arith.constant 13 : index
    %c0_51 = arith.constant 0 : index
    %c0_52 = arith.constant 0 : index
    %71 = vector.load %arg2[%c0_50, %c13, %c0_51, %c0_52] : memref<1x16x16x4xf32, #tpu.memory_space<vmem>>, vector<1x1x16x4xf32>
    %72 = vector.shape_cast %71 : vector<1x1x16x4xf32> to vector<16x4xf32>
    %73 = arith.maximumf %70, %72 : vector<16x4xf32>
    %c0_53 = arith.constant 0 : index
    %c14 = arith.constant 14 : index
    %c0_54 = arith.constant 0 : index
    %c0_55 = arith.constant 0 : index
    %74 = vector.load %arg2[%c0_53, %c14, %c0_54, %c0_55] : memref<1x16x16x4xf32, #tpu.memory_space<vmem>>, vector<1x1x16x4xf32>
    %75 = vector.shape_cast %74 : vector<1x1x16x4xf32> to vector<16x4xf32>
    %76 = arith.maximumf %73, %75 : vector<16x4xf32>
    %c0_56 = arith.constant 0 : index
    %c15 = arith.constant 15 : index
    %c0_57 = arith.constant 0 : index
    %c0_58 = arith.constant 0 : index
    %77 = vector.load %arg2[%c0_56, %c15, %c0_57, %c0_58] : memref<1x16x16x4xf32, #tpu.memory_space<vmem>>, vector<1x1x16x4xf32>
    %78 = vector.shape_cast %77 : vector<1x1x16x4xf32> to vector<16x4xf32>
    %79 = arith.maximumf %76, %78 : vector<16x4xf32>
    %80 = vector.extract_strided_slice %79 {offsets = [0, 0], sizes = [4, 4], strides = [1, 1]} : vector<16x4xf32> to vector<4x4xf32>
    %cst_59 = arith.constant dense<0xFF800000> : vector<4xf32>
    %81 = vector.multi_reduction <maximumf>, %80, %cst_59 [0] : vector<4x4xf32> to vector<4xf32>
    %82 = vector.shape_cast %81 : vector<4xf32> to vector<1x4xf32>
    %83 = vector.extract_strided_slice %79 {offsets = [4, 0], sizes = [4, 4], strides = [1, 1]} : vector<16x4xf32> to vector<4x4xf32>
    %cst_60 = arith.constant dense<0xFF800000> : vector<4xf32>
    %84 = vector.multi_reduction <maximumf>, %83, %cst_60 [0] : vector<4x4xf32> to vector<4xf32>
    %85 = vector.shape_cast %84 : vector<4xf32> to vector<1x4xf32>
    %86 = vector.extract_strided_slice %79 {offsets = [8, 0], sizes = [4, 4], strides = [1, 1]} : vector<16x4xf32> to vector<4x4xf32>
    %cst_61 = arith.constant dense<0xFF800000> : vector<4xf32>
    %87 = vector.multi_reduction <maximumf>, %86, %cst_61 [0] : vector<4x4xf32> to vector<4xf32>
    %88 = vector.shape_cast %87 : vector<4xf32> to vector<1x4xf32>
    %89 = vector.extract_strided_slice %79 {offsets = [12, 0], sizes = [4, 4], strides = [1, 1]} : vector<16x4xf32> to vector<4x4xf32>
    %cst_62 = arith.constant dense<0xFF800000> : vector<4xf32>
    %90 = vector.multi_reduction <maximumf>, %89, %cst_62 [0] : vector<4x4xf32> to vector<4xf32>
    %91 = vector.shape_cast %90 : vector<4xf32> to vector<1x4xf32>
    %92 = arith.maximumf %13, %16 : vector<1x4xf32>
    %93 = arith.maximumf %92, %36 : vector<1x4xf32>
    %94 = arith.maximumf %93, %39 : vector<1x4xf32>
    %95 = arith.maximumf %19, %22 : vector<1x4xf32>
    %96 = arith.maximumf %95, %42 : vector<1x4xf32>
    %97 = arith.maximumf %96, %45 : vector<1x4xf32>
    %98 = arith.maximumf %59, %62 : vector<1x4xf32>
    %99 = arith.maximumf %98, %82 : vector<1x4xf32>
    %100 = arith.maximumf %99, %85 : vector<1x4xf32>
    %101 = arith.maximumf %65, %68 : vector<1x4xf32>
    %102 = arith.maximumf %101, %88 : vector<1x4xf32>
    %103 = arith.maximumf %102, %91 : vector<1x4xf32>
    %104 = arith.maximumf %94, %97 : vector<1x4xf32>
    %105 = arith.maximumf %104, %100 : vector<1x4xf32>
    %106 = arith.maximumf %105, %103 : vector<1x4xf32>
    %107 = tpu.concatenate %106, %94, %97, %100, %103, %13, %16, %19, %22, %36, %39, %42, %45, %59, %62, %65 in 0 : vector<1x4xf32>, vector<1x4xf32>, vector<1x4xf32>, vector<1x4xf32>, vector<1x4xf32>, vector<1x4xf32>, vector<1x4xf32>, vector<1x4xf32>, vector<1x4xf32>, vector<1x4xf32>, vector<1x4xf32>, vector<1x4xf32>, vector<1x4xf32>, vector<1x4xf32>, vector<1x4xf32>, vector<1x4xf32> -> vector<16x4xf32>
    %108 = tpu.concatenate %68, %82, %85, %88, %91 in 0 : vector<1x4xf32>, vector<1x4xf32>, vector<1x4xf32>, vector<1x4xf32>, vector<1x4xf32> -> vector<5x4xf32>
    %109 = tpu.concatenate %107, %108 in 0 : vector<16x4xf32>, vector<5x4xf32> -> vector<21x4xf32>
    %c0_63 = arith.constant 0 : index
    %c0_64 = arith.constant 0 : index
    %c0_65 = arith.constant 0 : index
    %110 = vector.load %arg3[%c0_63, %c0_64, %c0_65] : memref<1x21x4xf32, #tpu.memory_space<vmem>>, vector<1x21x4xf32>
    %111 = vector.shape_cast %110 : vector<1x21x4xf32> to vector<21x4xf32>
    %112 = vector.shape_cast %109 : vector<21x4xf32> to vector<1x21x4xf32>
    tpu.vector_store %arg3[%c0_63, %c0_64, %c0_65], %112 {strides = array<i32>} : memref<1x21x4xf32, #tpu.memory_space<vmem>>, vector<1x21x4xf32>,
    return
  }
  func.func @transform_0(%arg0: i32, %arg1: i32) -> (i32, i32, i32, i32) {
    %c0_i32 = arith.constant 0 : i32
    %c0_i32_0 = arith.constant 0 : i32
    %c0_i32_1 = arith.constant 0 : i32
    return %arg0, %c0_i32, %c0_i32_0, %arg1 : i32, i32, i32, i32
  }
  func.func @transform_1(%arg0: i32, %arg1: i32) -> (i32, i32, i32) {
    %c0_i32 = arith.constant 0 : i32
    %c0_i32_0 = arith.constant 0 : i32
    return %arg0, %c0_i32, %arg1 : i32, i32, i32
  }
}

</mosaic_0001>

<bundles_post_ra>
// kernel: tpu_custom_call.1
= control target key start
LH: loop header
LB: loop body
LE: loop exit
PB: predicated region body
PF: predicated region fallthrough
CT: control target
= control target key end

     0   :  { %s561_s6 = smov 0   ;;  %s563_s7 = smov 0   ;;  %s700_s0 = inlined_call_operand.vmem [shape: f32[2,16,16,4], index: 0, kind: input, shape index: {}]   ;;  %s701_s1 = inlined_call_operand.vmem [shape: f32[2,21,4], index: 1, kind: output, shape index: {}]  }
   0x1   :  { %s565_s8 = smov 0  }
   0x2 LB: > { %s23_s9 = sadd.s32 1, %s545_s7  ;;  %p465_p0 = scmp.ge.s32.totalorder %s549_s8, 1  ;;  %s549_s8 = sphi %s565_s8, %s11_s8   ;;  %s545_s7 = sphi %s563_s7, %s703_s7   ;;  %s541_s6 = sphi %s561_s6, %s702_s6  }
   0x3   : > { %p25_p1 = scmp.ge.s32.totalorder %s23_s9, 2  ;;  %p106_p2 = scmp.lt.s32.totalorder %s549_s8, 3 }
   0x5   : > { %s705_s9 = smov (%p25_p1, %s23_s9), 0  ;;  %p107_p3 = pnand %p465_p0, %p106_p2 }
   0x6   : > { %p132_p4 = scmp.lt.s32.totalorder (!%p107_p3), %s541_s6, 1  ;;  %vm165_vm0 = vcmask (!%p107_p3), 27648   ;;  %vm173_vm1 = vcmask (!%p107_p3), 31748   ;;  %vm348_vm2 = vcmask (!%p107_p3), 1040384   ;;  %vm350_vm3 = vcmask (!%p107_p3), 1041408  }
   0x7   : > { %110 = sbr.rel (%p107_p3) target bundleno = 75 (0x4b), region = 24  ;;  %vm352_vm4 = vcmask (!%p107_p3), 1042432   ;;  %vm354_vm5 = vcmask (!%p107_p3), 1043456   ;;  %vm356_vm6 = vcmask (!%p107_p3), 1044480   ;;  %vm358_vm7 = vcmask (!%p107_p3), 1045504  }
   0x8   : > { %vm360_vm8 = vcmask (!%p107_p3), 1046528   ;;  %vm373_vm9 = vcmask (!%p107_p3), 31744   ;;  %vm376_vm10 = vcmask (!%p107_p3), 28672  }
   0xe   : > { %s707_s6 = smov (!%p132_p4, %s541_s6), 1 }
   0xf   : > { %s501_s10 = sshll.u32 %s707_s6, 8  ;;  %s502_s14 = smul.u32 24, %s707_s6 }
  0x10   : > { %s585_s13 = scalar_lea.vmem %s700_s0, %s501_s10 }
  0x11   : > { %v148_v0 = vld [vmem:[%s585_s13] sm:$0xff]  ;;  %v149_v1 = vld [vmem:[%s585_s13 + $0x8] sm:$0xff]  ;;  %v469_v2 = vld [vmem:[%s585_s13 + $0x10] sm:$0xff]  ;;  %s147_s17 = scalar_lea.vmem %s701_s1, %s502_s14 }
  0x12   : > { %v470_v3 = vld [vmem:[%s585_s13 + $0x18] sm:$0xff]  ;;  %v153_v4 = vmax.f32 %v148_v0, %v469_v2  ;;  %v471_v5 = vld [vmem:[%s585_s13 + $0x20] sm:$0xff]  ;;  %v472_v6 = vld [vmem:[%s585_s13 + $0x28] sm:$0xff] }
  0x13   : > { %v154_v7 = vmax.f32 %v149_v1, %v470_v3  ;;  %v473_v8 = vld [vmem:[%s585_s13 + $0x30] sm:$0xff]  ;;  %v474_v9 = vld [vmem:[%s585_s13 + $0x38] sm:$0xff]  ;;  %v475_v10 = vld [vmem:[%s585_s13 + $0x40] sm:$0xff] }
  0x14   : > { %v158_v11 = vmax.f32 %v153_v4, %v471_v5  ;;  %v476_v12 = vld [vmem:[%s585_s13 + $0x48] sm:$0xff]  ;;  %v477_v13 = vld [vmem:[%s585_s13 + $0x50] sm:$0xff]  ;;  %v478_v14 = vld [vmem:[%s585_s13 + $0x58] sm:$0xff] }
  0x15   : > { %v159_v15 = vmax.f32 %v154_v7, %v472_v6  ;;  %v201_v16 = vmax.f32 %v475_v10, %v477_v13  ;;  %v202_v17 = vmax.f32 %v476_v12, %v478_v14  ;;  %v479_v18 = vld [vmem:[%s585_s13 + $0x60] sm:$0xff]  ;;  %v480_v19 = vld [vmem:[%s585_s13 + $0x68] sm:$0xff]  ;;  %v481_v21 = vld [vmem:[%s585_s13 + $0x70] sm:$0xff] }
  0x16   : > { %v163_v20 = vmax.f32 %v158_v11, %v473_v8  ;;  %v483_v22 = vld [vmem:[%s585_s13 + $0x80] sm:$0xff]  ;;  %v484_v23 = vld [vmem:[%s585_s13 + $0x88] sm:$0xff]  ;;  %v482_v27 = vld [vmem:[%s585_s13 + $0x78] sm:$0xff] }
  0x17   : > { %v164_v24 = vmax.f32 %v159_v15, %v474_v9  ;;  %v206_v25 = vmax.f32 %v201_v16, %v479_v18  ;;  %v207_v26 = vmax.f32 %v202_v17, %v480_v19  ;;  %v485_v28 = vld [vmem:[%s585_s13 + $0x90] sm:$0xff]  ;;  %v486_v29 = vld [vmem:[%s585_s13 + $0x98] sm:$0xff]  ;;  %v487_v34 = vld [vmem:[%s585_s13 + $0xa0] sm:$0xff] }
  0x18   : > { %v166_v30 = vsel %vm165_vm0, %v163_v20, -inf  ;;  %v174_v31 = vsel %vm173_vm1, %v163_v20, -inf  ;;  %v247_v32 = vmax.f32 %v483_v22, %v485_v28  ;;  %v248_v33 = vmax.f32 %v484_v23, %v486_v29  ;;  %v488_v35 = vld [vmem:[%s585_s13 + $0xa8] sm:$0xff]  ;;  %v489_v12 = vld [vmem:[%s585_s13 + $0xb0] sm:$0xff]  ;;  %v490_v13 = vld [vmem:[%s585_s13 + $0xb8] sm:$0xff] }
  0x19   : > { %v167_v36 = vrot.slane %v166_v30, 4  ;;  %v175_v37 = vrot.slane %v174_v31, 4  ;;  %v181_v38 = vsel %vm165_vm0, %v164_v24, -inf  ;;  %v188_v39 = vsel %vm173_vm1, %v164_v24, -inf  ;;  %v491_v14 = vld [vmem:[%s585_s13 + $0xc0] sm:$0xff]  ;;  %v492_v19 = vld [vmem:[%s585_s13 + $0xc8] sm:$0xff] }
  0x1a   : > { %v182_v40 = vrot.slane %v181_v38, 4  ;;  %v189_v41 = vrot.slane %v188_v39, 4  ;;  %v211_v42 = vmax.f32 %v206_v25, %v481_v21  ;;  %v212_v43 = vmax.f32 %v207_v26, %v482_v27  ;;  %v493_v20 = vld [vmem:[%s585_s13 + $0xd0] sm:$0xff]  ;;  %v494_v21 = vld [vmem:[%s585_s13 + $0xd8] sm:$0xff] }
  0x1b   : > { %v168_v44 = vmax.f32 %v166_v30, %v167_v36  ;;  %v176_v45 = vmax.f32 %v174_v31, %v175_v37  ;;  %v252_v46 = vmax.f32 %v247_v32, %v487_v34  ;;  %v253_v47 = vmax.f32 %v248_v33, %v488_v35  ;;  %v495_v34 = vld [vmem:[%s585_s13 + $0xe0] sm:$0xff]  ;;  %v496_v35 = vld [vmem:[%s585_s13 + $0xe8] sm:$0xff] }
  0x1c   : > { %v183_v48 = vmax.f32 %v181_v38, %v182_v40  ;;  %v190_v49 = vmax.f32 %v188_v39, %v189_v41  ;;  %v213_v50 = vsel %vm165_vm0, %v211_v42, -inf  ;;  %v220_v51 = vsel %vm173_vm1, %v211_v42, -inf }
  0x1d   : > { %v169_v52 = vrot.slane %v168_v44, 2  ;;  %v177_v53 = vrot.slane %v176_v45, 2  ;;  %v214_v54 = vrot.slane %v213_v50, 4  ;;  %v221_v55 = vrot.slane %v220_v51, 4 }
  0x1e   : > { %v184_v56 = vrot.slane %v183_v48, 2  ;;  %v191_v57 = vrot.slane %v190_v49, 2  ;;  %v227_v58 = vsel %vm165_vm0, %v212_v43, -inf  ;;  %v234_v59 = vsel %vm173_vm1, %v212_v43, -inf }
  0x1f   : > { %v170_v60 = vmax.f32 %v168_v44, %v169_v52  ;;  %v178_v61 = vmax.f32 %v176_v45, %v177_v53  ;;  %v215_v62 = vmax.f32 %v213_v50, %v214_v54  ;;  %v222_v63 = vmax.f32 %v220_v51, %v221_v55  ;;  %v497_v44 = vld [vmem:[%s585_s13 + $0xf0] sm:$0xff]  ;;  %v498_v45 = vld [vmem:[%s585_s13 + $0xf8] sm:$0xff] }
  0x20   : > { %v185_v0 = vmax.f32 %v183_v48, %v184_v56  ;;  %v192_v1 = vmax.f32 %v190_v49, %v191_v57  ;;  %v228_v2 = vrot.slane %v227_v58, 4  ;;  %v235_v3 = vrot.slane %v234_v59, 4 }
  0x21   : > { %v171_v4 = vrot.slane %v170_v60, 1  ;;  %v179_v5 = vrot.slane %v178_v61, 1  ;;  %v216_v6 = vrot.slane %v215_v62, 2  ;;  %v223_v7 = vrot.slane %v222_v63, 2 }
  0x22   : > { %v186_v8 = vrot.slane %v185_v0, 1  ;;  %v193_v9 = vrot.slane %v192_v1, 1  ;;  %v229_v10 = vmax.f32 %v227_v58, %v228_v2  ;;  %v236_v11 = vmax.f32 %v234_v59, %v235_v3 }
  0x23   : > { %v620_v15 = vmax.f32 %v170_v60, %v171_v4  ;;  %v622_v16 = vmax.f32 %v178_v61, %v179_v5  ;;  %v217_v17 = vmax.f32 %v215_v62, %v216_v6  ;;  %v224_v18 = vmax.f32 %v222_v63, %v223_v7 }
  0x24   : > { %v627_v22 = vmax.f32 %v185_v0, %v186_v8  ;;  %v629_v23 = vmax.f32 %v192_v1, %v193_v9  ;;  %v230_v24 = vrot.slane %v229_v10, 2  ;;  %v237_v25 = vrot.slane %v236_v11, 2 }
  0x25   : > { %v218_v26 = vrot.slane %v217_v17, 1  ;;  %v225_v27 = vrot.slane %v224_v18, 1  ;;  %v257_v28 = vmax.f32 %v252_v46, %v489_v12  ;;  %v258_v29 = vmax.f32 %v253_v47, %v490_v13 }
  0x26   : > { %v231_v30 = vmax.f32 %v229_v10, %v230_v24  ;;  %v238_v31 = vmax.f32 %v236_v11, %v237_v25  ;;  %v293_v32 = vmax.f32 %v491_v14, %v493_v20  ;;  %v294_v33 = vmax.f32 %v492_v19, %v494_v21 }
  0x27   : > { %v633_v36 = vmax.f32 %v217_v17, %v218_v26  ;;  %v635_v37 = vmax.f32 %v224_v18, %v225_v27  ;;  %v259_v38 = vsel %vm165_vm0, %v257_v28, -inf  ;;  %v266_v39 = vsel %vm173_vm1, %v257_v28, -inf }
  0x28   : > { %v232_v40 = vrot.slane %v231_v30, 1  ;;  %v239_v41 = vrot.slane %v238_v31, 1  ;;  %v260_v42 = vrot.slane %v259_v38, 4  ;;  %v267_v43 = vrot.slane %v266_v39, 4 }
  0x29   : > { %v273_v46 = vsel %vm165_vm0, %v258_v29, -inf  ;;  %v280_v47 = vsel %vm173_vm1, %v258_v29, -inf  ;;  %v298_v48 = vmax.f32 %v293_v32, %v495_v34  ;;  %v299_v49 = vmax.f32 %v294_v33, %v496_v35 }
  0x2a   : > { %v643_v50 = vmax.f32 %v231_v30, %v232_v40  ;;  %v645_v51 = vmax.f32 %v238_v31, %v239_v41  ;;  %v261_v52 = vmax.f32 %v259_v38, %v260_v42  ;;  %v268_v53 = vmax.f32 %v266_v39, %v267_v43 }
  0x2b   : > { %v274_v54 = vrot.slane %v273_v46, 4  ;;  %v281_v55 = vrot.slane %v280_v47, 4  ;;  %v303_v56 = vmax.f32 %v298_v48, %v497_v44  ;;  %v304_v57 = vmax.f32 %v299_v49, %v498_v45 }
  0x2c   : > { %v262_v58 = vrot.slane %v261_v52, 2  ;;  %v269_v59 = vrot.slane %v268_v53, 2  ;;  %v333_v60 = vmax.f32 %v620_v15, %v622_v16  ;;  %v336_v61 = vmax.f32 %v627_v22, %v629_v23 }
  0x2d   : > { %v275_v62 = vmax.f32 %v273_v46, %v274_v54  ;;  %v282_v63 = vmax.f32 %v280_v47, %v281_v55  ;;  %v305_v0 = vsel %vm165_vm0, %v303_v56, -inf  ;;  %v312_v1 = vsel %vm173_vm1, %v303_v56, -inf }
  0x2e   : > { %v263_v2 = vmax.f32 %v261_v52, %v262_v58  ;;  %v270_v3 = vmax.f32 %v268_v53, %v269_v59  ;;  %v306_v4 = vrot.slane %v305_v0, 4  ;;  %v313_v5 = vrot.slane %v312_v1, 4 }
  0x2f   : > { %v276_v6 = vrot.slane %v275_v62, 2  ;;  %v283_v7 = vrot.slane %v282_v63, 2  ;;  %v319_v8 = vsel %vm165_vm0, %v304_v57, -inf  ;;  %v326_v9 = vsel %vm173_vm1, %v304_v57, -inf }
  0x30   : > { %v264_v10 = vrot.slane %v263_v2, 1  ;;  %v271_v11 = vrot.slane %v270_v3, 1  ;;  %v307_v12 = vmax.f32 %v305_v0, %v306_v4  ;;  %v314_v13 = vmax.f32 %v312_v1, %v313_v5 }
  0x31   : > { %v277_v14 = vmax.f32 %v275_v62, %v276_v6  ;;  %v284_v17 = vmax.f32 %v282_v63, %v283_v7  ;;  %v320_v18 = vrot.slane %v319_v8, 4  ;;  %v327_v19 = vrot.slane %v326_v9, 4 }
  0x32   : > { %v265_v20 = vmax.f32 %v263_v2, %v264_v10  ;;  %v272_v21 = vmax.f32 %v270_v3, %v271_v11  ;;  %v308_v24 = vrot.slane %v307_v12, 2  ;;  %v315_v25 = vrot.slane %v314_v13, 2 }
  0x33   : > { %v278_v26 = vrot.slane %v277_v14, 1  ;;  %v285_v27 = vrot.slane %v284_v17, 1  ;;  %v321_v28 = vmax.f32 %v319_v8, %v320_v18  ;;  %v328_v29 = vmax.f32 %v326_v9, %v327_v19 }
  0x34   : > { %v309_v30 = vmax.f32 %v307_v12, %v308_v24  ;;  %v316_v31 = vmax.f32 %v314_v13, %v315_v25  ;;  %v334_v32 = vmax.f32 %v333_v60, %v633_v36  ;;  %v337_v33 = vmax.f32 %v336_v61, %v643_v50 }
  0x35   : > { %v279_v34 = vmax.f32 %v277_v14, %v278_v26  ;;  %v286_v35 = vmax.f32 %v284_v17, %v285_v27  ;;  %v322_v38 = vrot.slane %v321_v28, 2  ;;  %v329_v39 = vrot.slane %v328_v29, 2 }
  0x36   : > { %v310_v40 = vrot.slane %v309_v30, 1  ;;  %v317_v41 = vrot.slane %v316_v31, 1  ;;  %v335_v42 = vmax.f32 %v334_v32, %v635_v37  ;;  %v338_v43 = vmax.f32 %v337_v33, %v645_v51 }
  0x37   : > { %v323_v44 = vmax.f32 %v321_v28, %v322_v38  ;;  %v330_v45 = vmax.f32 %v328_v29, %v329_v39  ;;  %v339_v46 = vmax.f32 %v265_v20, %v272_v21  ;;  %v362_v49 = vsel %vm348_vm2, %v629_v23, %v633_v36 }
  0x38   : > { %v311_v47 = vmax.f32 %v309_v30, %v310_v40  ;;  %v318_v48 = vmax.f32 %v316_v31, %v317_v41  ;;  %v342_v54 = vmax.f32 %v279_v34, %v286_v35  ;;  %v363_v55 = vsel %vm350_vm3, %v362_v49, %v635_v37 }
  0x39   : > { %v324_v52 = vrot.slane %v323_v44, 1  ;;  %v331_v53 = vrot.slane %v330_v45, 1  ;;  %v345_v57 = vmax.f32 %v335_v42, %v338_v43  ;;  %v364_v58 = vsel %vm352_vm4, %v363_v55, %v643_v50 }
  0x3a   : > { %v340_v56 = vmax.f32 %v339_v46, %v311_v47  ;;  %v369_v59 = vsel %vm348_vm2, %v286_v35, %v311_v47  ;;  %v365_v62 = vsel %vm354_vm5, %v364_v58, %v645_v51 }
  0x3b   : > { %v325_v60 = vmax.f32 %v323_v44, %v324_v52  ;;  %v332_v61 = vmax.f32 %v330_v45, %v331_v53  ;;  %v370_v23 = vsel %vm350_vm3, %v369_v59, %v318_v48  ;;  %v366_v37 = vsel %vm356_vm6, %v365_v62, %v265_v20 }
  0x3c   : > { %v341_v36 = vmax.f32 %v340_v56, %v318_v48  ;;  %v367_v50 = vsel %vm358_vm7, %v366_v37, %v272_v21 }
  0x3d   : > { %v343_v63 = vmax.f32 %v342_v54, %v325_v60  ;;  %v371_v0 = vsel %vm352_vm4, %v370_v23, %v325_v60  ;;  %v368_v2 = vsel %vm360_vm8, %v367_v50, %v279_v34 }
  0x3e   : > { %v346_v1 = vmax.f32 %v345_v57, %v341_v36  ;;  %v372_v51 = vsel %vm354_vm5, %v371_v0, %v332_v61  ;;  %375 = vst.msk [vmem:[%s147_s17 + $0x8] sm:$0xff] %vm373_vm9, %v368_v2 }
  0x3f   : > { %v344_v3 = vmax.f32 %v343_v63, %v332_v61  ;;  %377 = vst.msk [vmem:[%s147_s17 + $0x10] sm:$0x1f] %vm376_vm10, %v372_v51 }
  0x41   : > { %v347_v4 = vmax.f32 %v346_v1, %v344_v3 }
  0x43   : > { %v349_v5 = vsel %vm348_vm2, %v347_v4, %v335_v42 }
  0x44   : > { %v351_v6 = vsel %vm350_vm3, %v349_v5, %v338_v43 }
  0x45   : > { %v353_v7 = vsel %vm352_vm4, %v351_v6, %v341_v36 }
  0x46   : > { %v355_v8 = vsel %vm354_vm5, %v353_v7, %v344_v3 }
  0x47   : > { %v357_v9 = vsel %vm356_vm6, %v355_v8, %v620_v15 }
  0x48   : > { %v359_v10 = vsel %vm358_vm7, %v357_v9, %v622_v16 }
  0x49   : > { %v361_v11 = vsel %vm360_vm8, %v359_v10, %v627_v22 }
  0x4a   : > { %374 = vst.msk [vmem:[%s147_s17] sm:$0xff] %vm373_vm9, %v361_v11 }
  0x4b PF: > { %s11_s8 = sadd.s32 1, %s549_s8   ;;  %s702_s6 = smov %s545_s7 }
  0x4c   : > { %p8_p5 = scmp.ge.s32.totalorder %s11_s8, 4   ;;  %s703_s7 = smov %s705_s9 }
  0x4e   :  { %10 = sbr.rel (!%p8_p5) target bundleno = 2 (0x2), region = 69 }

</bundles_post_ra>
